<compile_context>
chip_gen: v5e
topology: v5e:2x2
jax: 0.10.0
libtpu: 0.0.40
codegen_flags: <defaults>
</compile_context>

<pallas_src>
import functools

import jax
import jax.numpy as jnp
from jax.experimental import pallas as pl
from jax.experimental.pallas import tpu as pltpu


# ----------------------------------------------------------------------------
# Kernel
# ----------------------------------------------------------------------------
def _activation(x, activ):
    if activ == "ReLU":
        return jnp.maximum(x, 0.0)
    if activ == "ELU":
        return jnp.where(x > 0, x, jnp.exp(x) - 1.0)
    if activ == "LReLU":
        return jnp.where(x > 0, x, 0.01 * x)
    raise ValueError(f"unknown activation {activ}")


def _mlp_kernel(x_ref, *refs, num_layers, activ, mxu_dtype):
    """refs = (w0, b0, w1, b1, ..., w_{L-1}, b_{L-1}, out_ref).

    Weights arrive pre-packed (block-diagonal, already in `mxu_dtype`);
    biases arrive tiled in f32.  Accumulation / bias / activation are f32.
    """
    out_ref = refs[-1]
    p = refs[:-1]

    h = x_ref[...]
    for l in range(num_layers):
        w = p[2 * l][...]          # (G*in_l, G*out_l), mxu_dtype
        b = p[2 * l + 1][...]      # (1, G*out_l), float32
        h = jnp.dot(h.astype(mxu_dtype), w,
                    preferred_element_type=jnp.float32) + b
        if l < num_layers - 1:     # no activation on the final layer
            h = _activation(h, activ)
    # Bias-add / activation / dtype cast folded into this single lane-dense store.
    out_ref[...] = h.astype(out_ref.dtype)


# ----------------------------------------------------------------------------
# Wrapper
# ----------------------------------------------------------------------------
def _round_up(x, m):
    return ((x + m - 1) // m) * m


def particle_encoder_forward(x, params, *, activ="ReLU", group=8,
                             block_rows=1024, out_dtype=jnp.float32,
                             mxu_dtype=jnp.bfloat16):
    """x: (..., num_features). params: list of (W (in,out), b (out,)) per layer.

    Returns (..., 2*latent) in `out_dtype` (float32 by default). Matmuls use
    `mxu_dtype` operands (bf16 by default) with float32 accumulation.
    `block_rows` counts *packed* rows (i.e. original rows / group).
    """
    orig_shape = x.shape
    feat = orig_shape[-1]
    x2 = x.reshape(-1, feat)
    n_rows = x2.shape[0]
    num_layers = len(params)
    out_dim = params[-1][0].shape[1]

    g = max(1, int(group))

    # Minimal padding: only up to a multiple of 8*g (sublane alignment of the
    # packed layout).  Partial last *blocks* are left to Pallas's masked
    # edge-block read/writeback (computation is purely row-wise, so extra rows
    # in a partial block are harmless), avoiding a pad-to-block-multiple HBM
    # pass in the common aligned case.
    row_align = 8 * g
    n_pad = _round_up(n_rows, row_align)
    if n_pad != n_rows:
        x2 = jnp.pad(x2, ((0, n_pad - n_rows), (0, 0)))

    np_rows = n_pad // g                      # packed rows
    xp = x2.reshape(np_rows, g * feat)        # free row-major reshape

    # Packed-row tile: sublane-aligned, clamped for small inputs.
    br = min(block_rows, np_rows)
    br = _round_up(br, 8)
    # v7x has 2 TensorCores: ensure >=2 grid steps when there is enough work so
    # the "parallel" row axis can be sharded across both cores.
    if pl.cdiv(np_rows, br) < 2 and np_rows >= 16:
        br = _round_up(pl.cdiv(np_rows, 2), 8)
    grid_rows = pl.cdiv(np_rows, br)

    # Pack parameters once at wrapper time:
    #   W_l -> block-diag(G copies of W_l)  (lane-dense matmul for every layer)
    #   b_l -> tile(b_l, G)
    in_specs = [pl.BlockSpec((br, g * feat), lambda i: (i, 0))]
    flat_params = []
    for w, b in params:
        wg = jnp.kron(jnp.eye(g, dtype=jnp.float32), w.astype(jnp.float32))
        wg = wg.astype(mxu_dtype)             # explicit bf16 MXU operands by default
        bg = jnp.tile(b.astype(jnp.float32), g).reshape(1, -1)
        # Constant index map -> weights/biases are DMA'd once and revisited.
        in_specs.append(pl.BlockSpec(wg.shape, lambda i: (0, 0)))
        in_specs.append(pl.BlockSpec(bg.shape, lambda i: (0, 0)))
        flat_params.extend([wg, bg])

    kernel = functools.partial(_mlp_kernel, num_layers=num_layers, activ=activ,
                               mxu_dtype=mxu_dtype)

    out_p = pl.pallas_call(
        kernel,
        out_shape=jax.ShapeDtypeStruct((np_rows, g * out_dim), out_dtype),
        grid_spec=pltpu.PrefetchScalarGridSpec(
            num_scalar_prefetch=0,
            grid=(grid_rows,),
            in_specs=in_specs,
            out_specs=pl.BlockSpec((br, g * out_dim), lambda i: (i, 0)),
        ),
        compiler_params=pltpu.CompilerParams(
            dimension_semantics=("parallel",),     # shards rows across v7x TCs
            vmem_limit_bytes=32 * 1024 * 1024,
        ),
    )(xp, *flat_params)

    out = out_p.reshape(n_pad, out_dim)            # free row-major unpack
    if n_pad != n_rows:
        out = out[:n_rows]
    return out.reshape(*orig_shape[:-1], out_dim)


# ----------------------------------------------------------------------------
# Deterministic parameter init (mimics torch.nn.Linear default U(-1/sqrt(in), 1/sqrt(in)))
# ----------------------------------------------------------------------------
def init_particle_encoder_params(key, num_inputs, num_hidden, num_outputs):
    dims = [num_inputs, *num_hidden, 2 * num_outputs]
    params = []
    for i in range(len(dims) - 1):
        fan_in, fan_out = dims[i], dims[i + 1]
        key, kw, kb = jax.random.split(key, 3)
        bound = 1.0 / jnp.sqrt(fan_in)
        w = jax.random.uniform(kw, (fan_in, fan_out), jnp.float32, -bound, bound)
        b = jax.random.uniform(kb, (fan_out,), jnp.float32, -bound, bound)
        params.append((w, b))
    return params


def _reference_forward(x, params, activ="ReLU"):
    h = x.reshape(-1, x.shape[-1]).astype(jnp.float32)
    for l, (w, b) in enumerate(params):
        h = h @ w + b
        if l < len(params) - 1:
            h = _activation(h, activ)
    return h.reshape(*x.shape[:-1], params[-1][0].shape[1])


# ----------------------------------------------------------------------------
# Main
# ----------------------------------------------------------------------------
if __name__ == "__main__":
    num_inputs = 4          # features per particle
    num_hidden = (32, 32)   # hidden layer widths
    num_outputs = 8         # latent dim -> output = 2 * latent = 16

    key = jax.random.PRNGKey(0)
    key, kp = jax.random.split(key)
    params = init_particle_encoder_params(kp, num_inputs, num_hidden, num_outputs)

    # (1) Perf-representative shape: 2048 rows, default fast path
    #     (G=8 packing, bf16 MXU operands, f32 output, 2 grid steps).
    key, k1 = jax.random.split(key)
    x_big = jax.random.normal(k1, (16, 128, num_inputs), jnp.float32)
    out_big = particle_encoder_forward(x_big, params, activ="ReLU")
    out_big = jax.block_until_ready(out_big)
    ref_big = _reference_forward(x_big, params, activ="ReLU")
    assert out_big.shape == (16, 128, 2 * num_outputs), out_big.shape
    assert out_big.dtype == jnp.float32, out_big.dtype
    assert jnp.allclose(out_big, ref_big, atol=2e-2, rtol=2e-2), \
        "bf16-MXU output mismatch vs reference"

    # (2) Small shape, f32 MXU-operand path.
    key, k2 = jax.random.split(key)
    x_small = jax.random.normal(k2, (2, 8, num_inputs), jnp.float32)
    out_f32 = particle_encoder_forward(x_small, params, activ="ReLU",
                                       mxu_dtype=jnp.float32)
    out_f32 = jax.block_until_ready(out_f32)
    ref_small = _reference_forward(x_small, params, activ="ReLU")
    assert out_f32.shape == (2, 8, 2 * num_outputs), out_f32.shape
    assert jnp.allclose(out_f32, ref_small, atol=2e-2, rtol=2e-2), \
        "f32-MXU output mismatch vs reference"

    # (3) Ragged row count (exercises the minimal pad + slice path) + ELU,
    #     bf16 output opt-in.
    key, k3 = jax.random.split(key)
    x_rag = jax.random.normal(k3, (3, 5, num_inputs), jnp.float32)
    out_rag = particle_encoder_forward(x_rag, params, activ="ELU",
                                       out_dtype=jnp.bfloat16)
    out_rag = jax.block_until_ready(out_rag)
    ref_rag = _reference_forward(x_rag, params, activ="ELU")
    assert out_rag.shape == (3, 5, 2 * num_outputs), out_rag.shape
    assert out_rag.dtype == jnp.bfloat16, out_rag.dtype
    assert jnp.allclose(out_rag.astype(jnp.float32), ref_rag,
                        atol=5e-2, rtol=5e-2), "ELU / ragged-rows mismatch"

    print("KERNEL_OK")
</pallas_src>

<mosaic_0001>
module attributes {stable_mosaic.version = 11 : i64} {
  func.func @_mlp_kernel(%arg0: i32, %arg1: memref<128x32xf32, #tpu.memory_space<vmem>>, %arg2: memref<32x256xbf16, #tpu.memory_space<vmem>>, %arg3: memref<1x256xf32, #tpu.memory_space<vmem>>, %arg4: memref<256x256xbf16, #tpu.memory_space<vmem>>, %arg5: memref<1x256xf32, #tpu.memory_space<vmem>>, %arg6: memref<256x128xbf16, #tpu.memory_space<vmem>>, %arg7: memref<1x128xf32, #tpu.memory_space<vmem>>, %arg8: memref<128x128xf32, #tpu.memory_space<vmem>>) attributes {dimension_semantics = [#tpu.dimension_semantics<parallel>], iteration_bounds = array<i64: 2>, scalar_prefetch = 0 : i64, scratch_operands = 0 : i64, tpu.core_type = #tpu.core_type<tc>, window_params = [{transform_indices = @transform_0, window_bounds = array<i64: 128, 32>}, {pipeline_mode = #tpu.pipeline_mode<synchronous>, transform_indices = @transform_1, window_bounds = array<i64: 32, 256>}, {pipeline_mode = #tpu.pipeline_mode<synchronous>, transform_indices = @transform_2, window_bounds = array<i64: 1, 256>}, {pipeline_mode = #tpu.pipeline_mode<synchronous>, transform_indices = @transform_3, window_bounds = array<i64: 256, 256>}, {pipeline_mode = #tpu.pipeline_mode<synchronous>, transform_indices = @transform_4, window_bounds = array<i64: 1, 256>}, {pipeline_mode = #tpu.pipeline_mode<synchronous>, transform_indices = @transform_5, window_bounds = array<i64: 256, 128>}, {pipeline_mode = #tpu.pipeline_mode<synchronous>, transform_indices = @transform_6, window_bounds = array<i64: 1, 128>}, {transform_indices = @transform_7, window_bounds = array<i64: 128, 128>}]} {
    %c0 = arith.constant 0 : index
    %c0_0 = arith.constant 0 : index
    %0 = vector.load %arg1[%c0, %c0_0] : memref<128x32xf32, #tpu.memory_space<vmem>>, vector<128x32xf32>
    %c0_1 = arith.constant 0 : index
    %c0_2 = arith.constant 0 : index
    %1 = vector.load %arg2[%c0_1, %c0_2] : memref<32x256xbf16, #tpu.memory_space<vmem>>, vector<32x256xbf16>
    %c0_3 = arith.constant 0 : index
    %c0_4 = arith.constant 0 : index
    %2 = vector.load %arg3[%c0_3, %c0_4] : memref<1x256xf32, #tpu.memory_space<vmem>>, vector<1x256xf32>
    %3 = arith.truncf %0 : vector<128x32xf32> to vector<128x32xbf16>
    %cst = arith.constant dense<0.000000e+00> : vector<128x256xf32>
    %4 = tpu.matmul %3, %1, %cst {dimension_numbers = #tpu.dot_dimension_numbers<[1], [0], [0], [1], [0, 0, 1, 1], [], []>} : vector<128x32xbf16>, vector<32x256xbf16>, vector<128x256xf32> -> vector<128x256xf32>
    %5 = vector.broadcast %2 : vector<1x256xf32> to vector<128x256xf32>
    %6 = arith.addf %4, %5 : vector<128x256xf32>
    %cst_5 = arith.constant 0.000000e+00 : f32
    %7 = vector.broadcast %cst_5 : f32 to vector<128x256xf32>
    %8 = arith.maximumf %6, %7 : vector<128x256xf32>
    %c0_6 = arith.constant 0 : index
    %c0_7 = arith.constant 0 : index
    %9 = vector.load %arg4[%c0_6, %c0_7] : memref<256x256xbf16, #tpu.memory_space<vmem>>, vector<256x256xbf16>
    %c0_8 = arith.constant 0 : index
    %c0_9 = arith.constant 0 : index
    %10 = vector.load %arg5[%c0_8, %c0_9] : memref<1x256xf32, #tpu.memory_space<vmem>>, vector<1x256xf32>
    %11 = arith.truncf %8 : vector<128x256xf32> to vector<128x256xbf16>
    %cst_10 = arith.constant dense<0.000000e+00> : vector<128x256xf32>
    %12 = tpu.matmul %11, %9, %cst_10 {dimension_numbers = #tpu.dot_dimension_numbers<[1], [0], [0], [1], [0, 0, 1, 1], [], []>} : vector<128x256xbf16>, vector<256x256xbf16>, vector<128x256xf32> -> vector<128x256xf32>
    %13 = vector.broadcast %10 : vector<1x256xf32> to vector<128x256xf32>
    %14 = arith.addf %12, %13 : vector<128x256xf32>
    %cst_11 = arith.constant 0.000000e+00 : f32
    %15 = vector.broadcast %cst_11 : f32 to vector<128x256xf32>
    %16 = arith.maximumf %14, %15 : vector<128x256xf32>
    %c0_12 = arith.constant 0 : index
    %c0_13 = arith.constant 0 : index
    %17 = vector.load %arg6[%c0_12, %c0_13] : memref<256x128xbf16, #tpu.memory_space<vmem>>, vector<256x128xbf16>
    %c0_14 = arith.constant 0 : index
    %c0_15 = arith.constant 0 : index
    %18 = vector.load %arg7[%c0_14, %c0_15] : memref<1x128xf32, #tpu.memory_space<vmem>>, vector<1x128xf32>
    %19 = arith.truncf %16 : vector<128x256xf32> to vector<128x256xbf16>
    %cst_16 = arith.constant dense<0.000000e+00> : vector<128x128xf32>
    %20 = tpu.matmul %19, %17, %cst_16 {dimension_numbers = #tpu.dot_dimension_numbers<[1], [0], [0], [1], [0, 0, 1, 1], [], []>} : vector<128x256xbf16>, vector<256x128xbf16>, vector<128x128xf32> -> vector<128x128xf32>
    %21 = vector.broadcast %18 : vector<1x128xf32> to vector<128x128xf32>
    %22 = arith.addf %20, %21 : vector<128x128xf32>
    %c0_17 = arith.constant 0 : index
    %c0_18 = arith.constant 0 : index
    %23 = vector.load %arg8[%c0_17, %c0_18] : memref<128x128xf32, #tpu.memory_space<vmem>>, vector<128x128xf32>
    tpu.vector_store %arg8[%c0_17, %c0_18], %22 {strides = array<i32>} : memref<128x128xf32, #tpu.memory_space<vmem>>, vector<128x128xf32>,
    return
  }
  func.func @transform_0(%arg0: i32) -> (i32, i32) {
    %c0_i32 = arith.constant 0 : i32
    %c0_i32_0 = arith.constant 0 : i32
    return %arg0, %c0_i32 : i32, i32
  }
  func.func @transform_1(%arg0: i32) -> (i32, i32) {
    %c0_i32 = arith.constant 0 : i32
    %c0_i32_0 = arith.constant 0 : i32
    %c0_i32_1 = arith.constant 0 : i32
    return %c0_i32, %c0_i32_0 : i32, i32
  }
  func.func @transform_2(%arg0: i32) -> (i32, i32) {
    %c0_i32 = arith.constant 0 : i32
    %c0_i32_0 = arith.constant 0 : i32
    %c0_i32_1 = arith.constant 0 : i32
    return %c0_i32, %c0_i32_0 : i32, i32
  }
  func.func @transform_3(%arg0: i32) -> (i32, i32) {
    %c0_i32 = arith.constant 0 : i32
    %c0_i32_0 = arith.constant 0 : i32
    %c0_i32_1 = arith.constant 0 : i32
    return %c0_i32, %c0_i32_0 : i32, i32
  }
  func.func @transform_4(%arg0: i32) -> (i32, i32) {
    %c0_i32 = arith.constant 0 : i32
    %c0_i32_0 = arith.constant 0 : i32
    %c0_i32_1 = arith.constant 0 : i32
    return %c0_i32, %c0_i32_0 : i32, i32
  }
  func.func @transform_5(%arg0: i32) -> (i32, i32) {
    %c0_i32 = arith.constant 0 : i32
    %c0_i32_0 = arith.constant 0 : i32
    %c0_i32_1 = arith.constant 0 : i32
    return %c0_i32, %c0_i32_0 : i32, i32
  }
  func.func @transform_6(%arg0: i32) -> (i32, i32) {
    %c0_i32 = arith.constant 0 : i32
    %c0_i32_0 = arith.constant 0 : i32
    %c0_i32_1 = arith.constant 0 : i32
    return %c0_i32, %c0_i32_0 : i32, i32
  }
  func.func @transform_7(%arg0: i32) -> (i32, i32) {
    %c0_i32 = arith.constant 0 : i32
    %c0_i32_0 = arith.constant 0 : i32
    return %arg0, %c0_i32 : i32, i32
  }
}

</mosaic_0001>

<bundles_post_ra>
// kernel: tpu_custom_call.1
= control target key start
LH: loop header
LB: loop body
LE: loop exit
PB: predicated region body
PF: predicated region fallthrough
CT: control target
= control target key end

     0   :  { %12 = vsyncpa [#allocation3], 0  ;;  %s2256_s0 = inlined_call_operand.vmem [shape: f32[256,32], index: 0, kind: input, shape index: {}]   ;;  %s2257_s1 = inlined_call_operand.vmem [shape: bf16[32,256], index: 1, kind: input, shape index: {}]   ;;  %s2258_s2 = inlined_call_operand.vmem [shape: f32[1,256], index: 2, kind: input, shape index: {}]   ;;  %s2259_s3 = inlined_call_operand.vmem [shape: bf16[256,256], index: 3, kind: input, shape index: {}]   ;;  %s2260_s4 = inlined_call_operand.vmem [shape: f32[1,256], index: 4, kind: input, shape index: {}]   ;;  %s2261_s5 = inlined_call_operand.hbm [shape: bf16[256,128], index: 5, kind: input, shape index: {}]   ;;  %s2262_s6 = inlined_call_operand.vmem [shape: f32[1,128], index: 6, kind: input, shape index: {}]   ;;  %s2263_s7 = inlined_call_operand.hbm [shape: f32[256,128], index: 7, kind: output, shape index: {}]  }
   0x1   :  { %13 = vsyncpa [#allocation4], 0 }
   0x2   :  { %15 = vsyncpa [#allocation4 + $0x1], 0  ;;  %s1790_s24 = smov 0   ;;  %s1792_s25 = smov 0  }
   0x3   :  { %s1794_s26 = smov 0   ;;  %s1796_s27 = smov 0  }
   0x4 LB: > { %s1811_s28 = sadd.s32 4294967295, %s1743_s27   ;;  %s1301_s29 = sadd.s32 4294967294, %s1743_s27   ;;  %s1743_s27 = sphi %s1796_s27, %s2269_s27   ;;  %s1739_s26 = sphi %s1794_s26, %s2268_s26   ;;  %s1735_s25 = sphi %s1792_s25, %s2267_s25   ;;  %s1731_s24 = sphi %s1790_s24, %s2266_s24  }
   0x5   : > { %s1815_s30 = sadd.s32 1, %s1743_s27   ;;  %s180_s8 = sadd.s32 1, %s1739_s26 }
   0x6   : > { %s177_s9 = ssub.s32 %s1743_s27, %s1815_s30  ;;  %p190_p0 = scmp.ne.s32.totalorder %s1739_s26, %s1735_s25 }
   0x7   : > { %p178_p1 = scmp.eq.s32.totalorder %s177_s9, 0  ;;  %p191_p2 = scmp.eq.s32.totalorder %s1811_s28, 1 }
   0x8   : > { %p196_p3 = scmp.ne.s32.totalorder %s1735_s25, %s1731_s24  ;;  %p197_p4 = scmp.eq.s32.totalorder %s1301_s29, 1 }
   0x9   : > { %s1826_s10 = scalar_select %p178_p1, %s1739_s26, %s180_s8  }
   0xa   : > { %p1828_p5 = por %p191_p2, %p190_p0  ;;  %p1832_p6 = por %p197_p4, %p196_p3 }
   0xb   : > { %p1302_p7 = scmp.ge.s32.totalorder %s1743_s27, 1  ;;  %p204_p8 = scmp.lt.s32.totalorder %s1743_s27, 3 }
   0xc   : > { %p1606_p9 = scmp.eq.s32.totalorder %s1811_s28, 0  ;;  %s227_s15 = sshll.u32 %s2261_s5, 4  ;;  %s228_s15 = int_to_ptr.hbm [resolvable:$true] %s227_s15 }
   0xd   : > { %p205_p10 = pnand %p1302_p7, %p204_p8  ;;  %s1745_s16 = smov [#allocation2]  }
   0xe   : > { %s229_s17 = sshll.u32 %s1745_s16, 4  ;;  %s1746_s18 = smov 64   ;;  %s230_s17 = int_to_ptr.vmem [resolvable:$true] %s229_s17 }
   0xf   : > { %p1598_p11 = pneg %p205_p10  ;;  %s1747_s19 = smov 4  }
  0x10   : > { %257 = sbr.rel (%p205_p10) target bundleno = 581 (0x245), region = 48 }
  0x11   : > { %p1599_p12 = pnand %p1606_p9, %p1598_p11 }
  0x13   : > { %1601 = dma.hbm_to_vmem [thread:$0]  (!%p1599_p12), %s228_s15, 2048, %s230_s17, [#allocation3], %s1746_s18, %s1746_s18, %s1747_s19  }
  0x15   : > { %1722 = dma.done.wait (%p1606_p9), [#allocation3], 2048  }
  0x16   : > { %1724 = vsyncadd (%p1606_p9), [#allocation3], 4294965248  ;;  %s1308_s20 = sshll.u32 %s1811_s28, 4  ;;  %v1320_v0 = vld [vmem:[%s2257_s1 + $0x10] sm:$0xf]  ;;  %vm352_vm0 = vcmask 261120  }
  0x17   : > { %p291_p13 = scmp.lt.s32.totalorder %s1308_s20, 31  ;;  %v1542_v1 = vld [vmem:[%s2257_s1 + $0x14] sm:$0xf0]  ;;  %v1541_v2 = vld [vmem:[%s2257_s1 + $0x14] sm:$0xf]  ;;  %s287_s14 = sand.u32 1, %s1735_s25  }
  0x18   : > { %v1321_v3 = vor.u32 %v1542_v1, %v1320_v0  ;;  %v1322_v4 = vld [vmem:[%s2257_s1 + $0x18] sm:$0xf0]  ;;  %v1312_v5 = vld [vmem:[%s2257_s1] sm:$0xf]  ;;  %v1540_v6 = vld [vmem:[%s2257_s1 + $0x4] sm:$0xf0] }
  0x19   : > { %s2271_s20 = smov (!%p291_p13, %s1308_s20), 31  ;;  %v1325_v7 = vor.u32 %v1541_v2, %v1322_v4  ;;  %v1539_v8 = vld [vmem:[%s2257_s1 + $0x4] sm:$0xf]  ;;  %v1314_v9 = vld [vmem:[%s2257_s1 + $0x8] sm:$0xf0]  ;;  %v1313_v10 = vor.u32 %v1540_v6, %v1312_v5  ;;  %s1307_s18 = sshll.u32 %s287_s14, 7 }
  0x1a   : > { %s1309_s21 = sshll.u32 %s2271_s20, 3  ;;  %383 = vmatpush.bf16.msra.mxu0 %v1321_v3  ;;  %v1317_v13 = vor.u32 %v1539_v8, %v1314_v9  ;;  %v1557_v14 = vld [vmem:[%s2259_s3 + $0x74] sm:$0xf]  ;;  %v1402_v15 = vld [vmem:[%s2259_s3 + $0x78] sm:$0xf0]  ;;  %s2189_s19 = scalar_lea.vmem [#allocation5], %s1307_s18 }
  0x1b   : > { %s1861_s16 = scalar_lea.vmem %s2256_s0, %s1309_s21  ;;  %432 = vmatpush.bf16.msra.mxu1 %v1325_v7  ;;  %v1573_v16 = vld [vmem:[%s2259_s3 + $0xf4] sm:$0xf]  ;;  %v1405_v17 = vor.u32 %v1557_v14, %v1402_v15  ;;  %v1466_v18 = vld [vmem:[%s2259_s3 + $0xf8] sm:$0xf0]  ;;  %v1555_v21 = vld [vmem:[%s2259_s3 + $0x64] sm:$0xf] }
  0x1c   : > { %v298_v11 = vld [vmem:[%s1861_s16] sm:$0xff]  ;;  %v299_v12 = vld [vmem:[%s1861_s16 + $0x8] sm:$0xff]  ;;  %v1469_v20 = vor.u32 %v1573_v16, %v1466_v18  ;;  %v300_v27 = vld [vmem:[%s1861_s16 + $0x10] sm:$0xff]  ;;  %s1591_s20 = sshll.u32 %s1811_s28, 7  ;;  %s1224_s8 = sshll.u32 %s2189_s19, 4  ;;  %s1225_s8 = int_to_ptr.vmem [resolvable:$true] %s1224_s8 }
  0x1d   : > { %v319_v19 = vpack.c.bf16 %v299_v12, %v298_v11  ;;  %v1394_v22 = vld [vmem:[%s2259_s3 + $0x68] sm:$0xf0]  ;;  %v1571_v23 = vld [vmem:[%s2259_s3 + $0xe4] sm:$0xf]  ;;  %v301_v28 = vld [vmem:[%s1861_s16 + $0x18] sm:$0xff]  ;;  %s1223_s29 = scalar_lea.hbm %s2263_s7, %s1591_s20  ;;  %s1212_s9 = scalar_lea.sflag [#allocation4], %s287_s14 }
  0x1e   : > { %384 = vmatpush.bf16.msra.mxu0 %v1313_v10  ;;  %v1397_v24 = vor.u32 %v1555_v21, %v1394_v22  ;;  %v1458_v25 = vld [vmem:[%s2259_s3 + $0xe8] sm:$0xf0]  ;;  %v320_v29 = vpack.c.bf16 %v301_v28, %v300_v27  ;;  %v1553_v30 = vld [vmem:[%s2259_s3 + $0x54] sm:$0xf]  ;;  %v1386_v31 = vld [vmem:[%s2259_s3 + $0x58] sm:$0xf0] }
  0x1f   : > { %433 = vmatpush.bf16.msra.mxu1 %v1317_v13  ;;  %v1461_v26 = vor.u32 %v1571_v23, %v1458_v25  ;;  %v1569_v32 = vld [vmem:[%s2259_s3 + $0xd4] sm:$0xf]  ;;  %v1389_v33 = vor.u32 %v1553_v30, %v1386_v31  ;;  %v1450_v34 = vld [vmem:[%s2259_s3 + $0xd8] sm:$0xf0]  ;;  %v302_v36 = vld [vmem:[%s1861_s16 + $0x20] sm:$0xff]  ;;  %s1226_s21 = sshll.u32 %s1223_s29, 4  ;;  %s1227_s21 = int_to_ptr.hbm [resolvable:$true] %s1226_s21 }
  0x20   : > { %v1453_v35 = vor.u32 %v1569_v32, %v1450_v34  ;;  %v303_v37 = vld [vmem:[%s1861_s16 + $0x28] sm:$0xff]  ;;  %v1551_v39 = vld [vmem:[%s2259_s3 + $0x44] sm:$0xf]  ;;  %v304_v45 = vld [vmem:[%s1861_s16 + $0x30] sm:$0xff]  ;;  %s1691_s28 = sshra.s32 %s1227_s21, 4  ;;  %s1697_s17 = scalar_lea.hbm %s2263_s7, 256  ;;  %s1692_s28 = int_to_ptr.hbm [resolvable:$true] %s1691_s28 }
  0x21   : > { %1326 = vmatmul.msk.bf16.vlgmr.msra.gmra.mxu0 %vm352_vm0, %v319_v19  ;;  %v321_v38 = vpack.c.bf16 %v303_v37, %v302_v36  ;;  %v1378_v40 = vld [vmem:[%s2259_s3 + $0x48] sm:$0xf0]  ;;  %v1567_v41 = vld [vmem:[%s2259_s3 + $0xc4] sm:$0xf]  ;;  %v305_v46 = vld [vmem:[%s1861_s16 + $0x38] sm:$0xff]  ;;  %p1698_p3 = scmp.lt.s32.totalorder %s1692_s28, %s2263_s7 }
  0x22   : > { %819 = vmatpush.bf16.msrb.mxu0 %v1405_v17  ;;  %1334 = vmatmul.msk.bf16.vlgmr.msra.gmra.mxu1 %vm352_vm0, %v319_v19  ;;  %v1381_v42 = vor.u32 %v1551_v39, %v1378_v40  ;;  %v1442_v43 = vld [vmem:[%s2259_s3 + $0xc8] sm:$0xf0]  ;;  %v322_v47 = vpack.c.bf16 %v305_v46, %v304_v45  ;;  %v1549_v48 = vld [vmem:[%s2259_s3 + $0x34] sm:$0xf]  ;;  %v1370_v49 = vld [vmem:[%s2259_s3 + $0x38] sm:$0xf0] }
  0x23   : > { %868 = vmatpush.bf16.msrb.mxu1 %v1469_v20  ;;  %v1445_v44 = vor.u32 %v1567_v41, %v1442_v43  ;;  %v1565_v50 = vld [vmem:[%s2259_s3 + $0xb4] sm:$0xf]  ;;  %v1373_v51 = vor.u32 %v1549_v48, %v1370_v49  ;;  %v1434_v52 = vld [vmem:[%s2259_s3 + $0xb8] sm:$0xf0]  ;;  %v306_v54 = vld [vmem:[%s1861_s16 + $0x40] sm:$0xff] }
  0x24   : > { %v1437_v53 = vor.u32 %v1565_v50, %v1434_v52  ;;  %v307_v55 = vld [vmem:[%s1861_s16 + $0x48] sm:$0xff]  ;;  %v1547_v57 = vld [vmem:[%s2259_s3 + $0x24] sm:$0xf]  ;;  %v1400_v62 = vld [vmem:[%s2259_s3 + $0x70] sm:$0xf] }
  0x25   : > { %v323_v56 = vpack.c.bf16 %v307_v55, %v306_v54  ;;  %v1362_v58 = vld [vmem:[%s2259_s3 + $0x28] sm:$0xf0]  ;;  %v1563_v59 = vld [vmem:[%s2259_s3 + $0xa4] sm:$0xf]  ;;  %v1558_v63 = vld [vmem:[%s2259_s3 + $0x74] sm:$0xf0] }
  0x26   : > { %820 = vmatpush.bf16.msrb.mxu0 %v1397_v24  ;;  %v1365_v60 = vor.u32 %v1547_v57, %v1362_v58  ;;  %v1426_v61 = vld [vmem:[%s2259_s3 + $0xa8] sm:$0xf0]  ;;  %v1401_v1 = vor.u32 %v1558_v63, %v1400_v62  ;;  %v1464_v2 = vld [vmem:[%s2259_s3 + $0xf0] sm:$0xf]  ;;  %v1574_v3 = vld [vmem:[%s2259_s3 + $0xf4] sm:$0xf0] }
  0x27   : > { %869 = vmatpush.bf16.msrb.mxu1 %v1461_v26  ;;  %v1429_v0 = vor.u32 %v1563_v59, %v1426_v61  ;;  %v1465_v4 = vor.u32 %v1574_v3, %v1464_v2  ;;  %v308_v5 = vld [vmem:[%s1861_s16 + $0x50] sm:$0xff]  ;;  %v309_v6 = vld [vmem:[%s1861_s16 + $0x58] sm:$0xff]  ;;  %v1392_v8 = vld [vmem:[%s2259_s3 + $0x60] sm:$0xf] }
  0x28   : > { %721 = vmatpush.bf16.msra.mxu2 %v1401_v1  ;;  %v324_v7 = vpack.c.bf16 %v309_v6, %v308_v5  ;;  %v1556_v9 = vld [vmem:[%s2259_s3 + $0x64] sm:$0xf0]  ;;  %v1456_v10 = vld [vmem:[%s2259_s3 + $0xe0] sm:$0xf]  ;;  %v1545_v14 = vld [vmem:[%s2259_s3 + $0x14] sm:$0xf] }
  0x29   : > { %770 = vmatpush.bf16.msra.mxu3 %v1465_v4  ;;  %v1393_v11 = vor.u32 %v1556_v9, %v1392_v8  ;;  %v1572_v12 = vld [vmem:[%s2259_s3 + $0xe4] sm:$0xf0]  ;;  %v1354_v15 = vld [vmem:[%s2259_s3 + $0x18] sm:$0xf0]  ;;  %v1384_v16 = vld [vmem:[%s2259_s3 + $0x50] sm:$0xf] }
  0x2a   : > { %821 = vmatpush.bf16.msrb.mxu0 %v1389_v33  ;;  %v1457_v13 = vor.u32 %v1572_v12, %v1456_v10  ;;  %v1357_v17 = vor.u32 %v1545_v14, %v1354_v15  ;;  %v1554_v18 = vld [vmem:[%s2259_s3 + $0x54] sm:$0xf0]  ;;  %v1448_v19 = vld [vmem:[%s2259_s3 + $0xd0] sm:$0xf]  ;;  %v1561_v23 = vld [vmem:[%s2259_s3 + $0x94] sm:$0xf] }
  0x2b   : > { %870 = vmatpush.bf16.msrb.mxu1 %v1453_v35  ;;  %v1570_v20 = vld [vmem:[%s2259_s3 + $0xd4] sm:$0xf0]  ;;  %v1385_v21 = vor.u32 %v1554_v18, %v1384_v16  ;;  %v1418_v24 = vld [vmem:[%s2259_s3 + $0x98] sm:$0xf0]  ;;  %v1376_v25 = vld [vmem:[%s2259_s3 + $0x40] sm:$0xf] }
  0x2c   : > { %722 = vmatpush.bf16.msra.mxu2 %v1393_v11  ;;  %v1449_v22 = vor.u32 %v1570_v20, %v1448_v19  ;;  %v1421_v26 = vor.u32 %v1561_v23, %v1418_v24  ;;  %v1552_v27 = vld [vmem:[%s2259_s3 + $0x44] sm:$0xf0]  ;;  %v1440_v28 = vld [vmem:[%s2259_s3 + $0xc0] sm:$0xf]  ;;  %v1368_v34 = vld [vmem:[%s2259_s3 + $0x30] sm:$0xf] }
  0x2d   : > { %771 = vmatpush.bf16.msra.mxu3 %v1457_v13  ;;  %v1377_v30 = vor.u32 %v1552_v27, %v1376_v25  ;;  %v310_v32 = vld [vmem:[%s1861_s16 + $0x60] sm:$0xff]  ;;  %v311_v33 = vld [vmem:[%s1861_s16 + $0x68] sm:$0xff]  ;;  %v1550_v35 = vld [vmem:[%s2259_s3 + $0x34] sm:$0xf0] }
  0x2e   : > { %822 = vmatpush.bf16.msrb.mxu0 %v1381_v42  ;;  %v1432_v36 = vld [vmem:[%s2259_s3 + $0xb0] sm:$0xf]  ;;  %v325_v37 = vpack.c.bf16 %v311_v33, %v310_v32  ;;  %v1566_v39 = vld [vmem:[%s2259_s3 + $0xb4] sm:$0xf0]  ;;  %v1360_v41 = vld [vmem:[%s2259_s3 + $0x20] sm:$0xf] }
  0x2f   : > { %871 = vmatpush.bf16.msrb.mxu1 %v1445_v44  ;;  %v1433_v40 = vor.u32 %v1566_v39, %v1432_v36  ;;  %v1548_v42 = vld [vmem:[%s2259_s3 + $0x24] sm:$0xf0]  ;;  %v1424_v44 = vld [vmem:[%s2259_s3 + $0xa0] sm:$0xf]  ;;  %v1346_v48 = vld [vmem:[%s2259_s3 + $0x8] sm:$0xf0] }
  0x30   : > { %723 = vmatpush.bf16.msra.mxu2 %v1385_v21  ;;  %v1361_v43 = vor.u32 %v1548_v42, %v1360_v41  ;;  %v1564_v45 = vld [vmem:[%s2259_s3 + $0xa4] sm:$0xf0]  ;;  %v1352_v50 = vld [vmem:[%s2259_s3 + $0x10] sm:$0xf]  ;;  %v1562_v54 = vld [vmem:[%s2259_s3 + $0x94] sm:$0xf0] }
  0x31   : > { %1327 = vmatmul.msk.bf16.gmra.mxu0 %vm352_vm0, %v320_v29  ;;  %772 = vmatpush.bf16.msra.mxu3 %v1449_v22  ;;  %v1425_v46 = vor.u32 %v1564_v45, %v1424_v44  ;;  %v1416_v52 = vld [vmem:[%s2259_s3 + $0x90] sm:$0xf]  ;;  %v1410_v57 = vld [vmem:[%s2259_s3 + $0x88] sm:$0xf0]  ;;  %v1344_v58 = vld [vmem:[%s2259_s3] sm:$0xf] }
  0x32   : > { %1335 = vmatmul.msk.bf16.gmra.mxu1 %vm352_vm0, %v320_v29  ;;  %823 = vmatpush.bf16.msrb.mxu0 %v1373_v51  ;;  %v1568_v29 = vld [vmem:[%s2259_s3 + $0xc4] sm:$0xf0]  ;;  %v1546_v51 = vld [vmem:[%s2259_s3 + $0x14] sm:$0xf0]  ;;  %v1417_v55 = vor.u32 %v1562_v54, %v1416_v52  ;;  %v1408_v61 = vld [vmem:[%s2259_s3 + $0x80] sm:$0xf] }
  0x33   : > { %872 = vmatpush.bf16.msrb.mxu1 %v1437_v53  ;;  %v1441_v31 = vor.u32 %v1568_v29, %v1440_v28  ;;  %v1353_v53 = vor.u32 %v1546_v51, %v1352_v50  ;;  %v1560_v62 = vld [vmem:[%s2259_s3 + $0x84] sm:$0xf0]  ;;  %v312_v63 = vld [vmem:[%s1861_s16 + $0x70] sm:$0xff]  ;;  %v318_v4 = vld [vmem:[%s2258_s2] sm:$0x3] }
  0x34   : > { %724 = vmatpush.bf16.msra.mxu2 %v1377_v30  ;;  %v1409_v2 = vor.u32 %v1560_v62, %v1408_v61  ;;  %v2107_v8 = vperm.slane %v318_v4, 1  ;;  %v1582_v9 = vld [vmem:[#allocation2 + $0x38] sm:$0xff]  ;;  %v1581_v25 = vld [vmem:[#allocation2 + $0x30] sm:$0xff]  ;;  %v1580_v41 = vld [vmem:[#allocation2 + $0x28] sm:$0xff] }
  0x35   : > { %773 = vmatpush.bf16.msra.mxu3 %v1441_v31  ;;  %v1590_v10 = vld [vmem:[#allocation2 + $0x78] sm:$0xff]  ;;  %v1588_v42 = vld [vmem:[#allocation2 + $0x68] sm:$0xff] }
  0x36   : > { %824 = vmatpush.bf16.msrb.mxu0 %v1365_v60  ;;  %v1544_v60 = vld [vmem:[%s2259_s3 + $0x4] sm:$0xf0] }
  0x37   : > { %873 = vmatpush.bf16.msrb.mxu1 %v1429_v0  ;;  %v313_v0 = vld [vmem:[%s1861_s16 + $0x78] sm:$0xff]  ;;  %v1345_v1 = vor.u32 %v1544_v60, %v1344_v58  ;;  %v1587_v58 = vld [vmem:[#allocation2 + $0x60] sm:$0xff]  ;;  %s1693_s16 = scalar_lea.hbm %s1692_s28, 128 }
  0x38   : > { %v326_v3 = vpack.c.bf16 %v313_v0, %v312_v63  ;;  %p1694_p0 = scmp.ne.s32.totalorder %s1692_s28, %s1693_s16  ;;  %p1699_p4 = scmp.lt.s32.totalorder %s1697_s17, %s1693_s16 }
  0x39   : > { %774 = vmatpush.bf16.msra.mxu3 %v1433_v40 }
  0x3a   : > { %825 = vmatpush.bf16.msrb.mxu0 %v1357_v17  ;;  %p1695_p1 = pnand %p1694_p0, %p1828_p5  ;;  %p1700_p7 = por %p1699_p4, %p1698_p3 }
  0x3b   : > { %874 = vmatpush.bf16.msrb.mxu1 %v1421_v26  ;;  %v1589_v26 = vld [vmem:[#allocation2 + $0x70] sm:$0xff] }
  0x3c   : > { %p1696_p2 = pneg %p1695_p1 }
  0x3d   : > { %775 = vmatpush.bf16.msra.mxu3 %v1425_v46 }
  0x3e   : > { %p1701_p8 = pnand %p1700_p7, %p1696_p2 }
  0x41   : > { %1328 = vmatmul.msk.bf16.gmra.mxu0 %vm352_vm0, %v321_v38  ;;  %776 = vmatpush.bf16.msra.mxu3 %v1417_v55 }
  0x42   : > { %1336 = vmatmul.msk.bf16.gmra.mxu1 %vm352_vm0, %v321_v38  ;;  %v1369_v38 = vor.u32 %v1550_v35, %v1368_v34 }
  0x44   : > { %725 = vmatpush.bf16.msra.mxu2 %v1369_v38 }
  0x45   : > { %777 = vmatpush.bf16.msra.mxu3 %v1409_v2 }
  0x48   : > { %726 = vmatpush.bf16.msra.mxu2 %v1361_v43 }
  0x49   : > { %1146 = vmatpush.bf16.msrb.mxu3 %v1590_v10 }
  0x4c   : > { %727 = vmatpush.bf16.msra.mxu2 %v1353_v53 }
  0x4d   : > { %1147 = vmatpush.bf16.msrb.mxu3 %v1589_v26 }
  0x50   : > { %728 = vmatpush.bf16.msra.mxu2 %v1345_v1 }
  0x51   : > { %1329 = vmatmul.msk.bf16.gmra.mxu0 %vm352_vm0, %v322_v47  ;;  %1148 = vmatpush.bf16.msrb.mxu3 %v1588_v42  ;;  %v1576_v42 = vld [vmem:[#allocation2 + $0x8] sm:$0xff] }
  0x52   : > { %1337 = vmatmul.msk.bf16.gmra.mxu1 %vm352_vm0, %v322_v47  ;;  %v1543_v47 = vld [vmem:[%s2259_s3 + $0x4] sm:$0xf] }
  0x53   : > { %v1349_v49 = vor.u32 %v1543_v47, %v1346_v48 }
  0x54   : > { %1097 = vmatpush.bf16.msrb.mxu2 %v1582_v9 }
  0x55   : > { %826 = vmatpush.bf16.msrb.mxu0 %v1349_v49  ;;  %1149 = vmatpush.bf16.msrb.mxu3 %v1587_v58 }
  0x58   : > { %1098 = vmatpush.bf16.msrb.mxu2 %v1581_v25 }
  0x5c   : > { %1099 = vmatpush.bf16.msrb.mxu2 %v1580_v41 }
  0x61   : > { %1330 = vmatmul.msk.bf16.gmra.mxu0 %vm352_vm0, %v323_v56 }
  0x62   : > { %1338 = vmatmul.msk.bf16.gmra.mxu1 %vm352_vm0, %v323_v56  ;;  %v1559_v56 = vld [vmem:[%s2259_s3 + $0x84] sm:$0xf] }
  0x63   : > { %v1413_v59 = vor.u32 %v1559_v56, %v1410_v57  ;;  %v1579_v57 = vld [vmem:[#allocation2 + $0x20] sm:$0xff] }
  0x64   : > { %1100 = vmatpush.bf16.msrb.mxu2 %v1579_v57 }
  0x65   : > { %875 = vmatpush.bf16.msrb.mxu1 %v1413_v59 }
  0x71   : > { %1331 = vmatmul.msk.bf16.gmra.mxu0 %vm352_vm0, %v324_v7 }
  0x72   : > { %1339 = vmatmul.msk.bf16.gmra.mxu1 %vm352_vm0, %v324_v7  ;;  %v2105_v7 = vperm.slane %v318_v4, 0 }
  0x81   : > { %1332 = vmatmul.msk.bf16.gmra.mxu0 %vm352_vm0, %v325_v37 }
  0x82   : > { %1340 = vmatmul.msk.bf16.gmra.mxu1 %vm352_vm0, %v325_v37 }
  0x91   : > { %1333 = vmatmul.msk.bf16.gmra.mxu0 %vm352_vm0, %v326_v3 }
  0x92   : > { %1341 = vmatmul.msk.bf16.gmra.mxu1 %vm352_vm0, %v326_v3 }
  0x9e   : > { %v386_v5 = vpop.f32.mrf.mxu0 }
  0x9f   : > { %v435_v6 = vpop.f32.mrf.mxu1  ;;  %v387_v11 = vadd.f32 %v386_v5, %v2105_v7 }
  0xa0   : > { %v436_v12 = vadd.f32 %v435_v6, %v2107_v8 }
  0xa1   : > { %v475_v17 = vmax.f32 %v387_v11, 0.0  ;;  %v1578_v11 = vld [vmem:[#allocation2 + $0x18] sm:$0xff] }
  0xa2   : > { %v476_v19 = vmax.f32 %v436_v12, 0.0  ;;  %v1586_v12 = vld [vmem:[#allocation2 + $0x58] sm:$0xff]  ;;  %1101 = vmatpush.bf16.msrb.mxu2 %v1578_v11 }
  0xa3   : > { %1150 = vmatpush.bf16.msrb.mxu3 %v1586_v12 }
  0xa6   : > { %v388_v13 = vpop.f32.mrf.mxu0 }
  0xa7   : > { %v389_v14 = vadd.f32 %v388_v13, %v2105_v7  ;;  %v437_v15 = vpop.f32.mrf.mxu1 }
  0xa8   : > { %v438_v16 = vadd.f32 %v437_v15, %v2107_v8 }
  0xa9   : > { %v477_v18 = vmax.f32 %v389_v14, 0.0 }
  0xaa   : > { %v478_v20 = vmax.f32 %v438_v16, 0.0 }
  0xab   : > { %v540_v21 = vpack.c.bf16 %v477_v18, %v475_v17 }
  0xac   : > { %v541_v22 = vpack.c.bf16 %v478_v20, %v476_v19 }
  0xad   : > { %729 = vmatmul.bf16.vlgmr.msra.gmra.mxu2 %v540_v21  ;;  %827 = vmatmul.bf16.vlgmr.msrb.gmra.mxu0 %v540_v21 }
  0xae   : > { %778 = vmatmul.bf16.vlgmr.msra.gmra.mxu3 %v541_v22  ;;  %876 = vmatmul.bf16.vlgmr.msrb.gmra.mxu1 %v541_v22  ;;  %v391_v23 = vpop.f32.mrf.mxu0 }
  0xaf   : > { %v440_v24 = vpop.f32.mrf.mxu1  ;;  %v392_v27 = vadd.f32 %v391_v23, %v2105_v7 }
  0xb0   : > { %v441_v28 = vadd.f32 %v440_v24, %v2107_v8 }
  0xb1   : > { %v479_v33 = vmax.f32 %v392_v27, 0.0  ;;  %v1577_v27 = vld [vmem:[#allocation2 + $0x10] sm:$0xff] }
  0xb2   : > { %v480_v35 = vmax.f32 %v441_v28, 0.0  ;;  %v1585_v28 = vld [vmem:[#allocation2 + $0x50] sm:$0xff]  ;;  %1102 = vmatpush.bf16.msrb.mxu2 %v1577_v27 }
  0xb3   : > { %1151 = vmatpush.bf16.msrb.mxu3 %v1585_v28 }
  0xb6   : > { %v393_v29 = vpop.f32.mrf.mxu0  ;;  %1103 = vmatpush.bf16.msrb.mxu2 %v1576_v42 }
  0xb7   : > { %v394_v30 = vadd.f32 %v393_v29, %v2105_v7  ;;  %v442_v31 = vpop.f32.mrf.mxu1 }
  0xb8   : > { %v443_v32 = vadd.f32 %v442_v31, %v2107_v8 }
  0xb9   : > { %v481_v34 = vmax.f32 %v394_v30, 0.0 }
  0xba   : > { %v482_v36 = vmax.f32 %v443_v32, 0.0 }
  0xbb   : > { %v542_v37 = vpack.c.bf16 %v481_v34, %v479_v33 }
  0xbc   : > { %v543_v38 = vpack.c.bf16 %v482_v36, %v480_v35 }
  0xbd   : > { %734 = vmatmul.bf16.gmra.mxu2 %v542_v37  ;;  %832 = vmatmul.bf16.gmra.mxu0 %v542_v37 }
  0xbe   : > { %783 = vmatmul.bf16.gmra.mxu3 %v543_v38  ;;  %881 = vmatmul.bf16.gmra.mxu1 %v543_v38  ;;  %v396_v39 = vpop.f32.mrf.mxu0 }
  0xbf   : > { %v445_v40 = vpop.f32.mrf.mxu1  ;;  %v397_v43 = vadd.f32 %v396_v39, %v2105_v7 }
  0xc0   : > { %v446_v44 = vadd.f32 %v445_v40, %v2107_v8 }
  0xc1   : > { %v483_v49 = vmax.f32 %v397_v43, 0.0  ;;  %v1584_v43 = vld [vmem:[#allocation2 + $0x48] sm:$0xff] }
  0xc2   : > { %v484_v51 = vmax.f32 %v446_v44, 0.0  ;;  %1152 = vmatpush.bf16.msrb.mxu3 %v1584_v43 }
  0xc6   : > { %v398_v45 = vpop.f32.mrf.mxu0 }
  0xc7   : > { %v399_v46 = vadd.f32 %v398_v45, %v2105_v7  ;;  %v447_v47 = vpop.f32.mrf.mxu1 }
  0xc8   : > { %v448_v48 = vadd.f32 %v447_v47, %v2107_v8 }
  0xc9   : > { %v485_v50 = vmax.f32 %v399_v46, 0.0 }
  0xca   : > { %v486_v52 = vmax.f32 %v448_v48, 0.0 }
  0xcb   : > { %v544_v53 = vpack.c.bf16 %v485_v50, %v483_v49 }
  0xcc   : > { %v545_v54 = vpack.c.bf16 %v486_v52, %v484_v51 }
  0xcd   : > { %739 = vmatmul.bf16.gmra.mxu2 %v544_v53  ;;  %837 = vmatmul.bf16.gmra.mxu0 %v544_v53 }
  0xce   : > { %788 = vmatmul.bf16.gmra.mxu3 %v545_v54  ;;  %886 = vmatmul.bf16.gmra.mxu1 %v545_v54  ;;  %v401_v55 = vpop.f32.mrf.mxu0 }
  0xcf   : > { %v450_v56 = vpop.f32.mrf.mxu1  ;;  %v402_v59 = vadd.f32 %v401_v55, %v2105_v7 }
  0xd0   : > { %v451_v60 = vadd.f32 %v450_v56, %v2107_v8 }
  0xd1   : > { %v487_v1 = vmax.f32 %v402_v59, 0.0 }
  0xd2   : > { %v488_v3 = vmax.f32 %v451_v60, 0.0  ;;  %v1575_v60 = vld [vmem:[#allocation2] sm:$0xff] }
  0xd3   : > { %1104 = vmatpush.bf16.msrb.mxu2 %v1575_v60 }
  0xd6   : > { %v403_v61 = vpop.f32.mrf.mxu0 }
  0xd7   : > { %v404_v62 = vadd.f32 %v403_v61, %v2105_v7  ;;  %v452_v63 = vpop.f32.mrf.mxu1 }
  0xd8   : > { %v453_v0 = vadd.f32 %v452_v63, %v2107_v8 }
  0xd9   : > { %v489_v2 = vmax.f32 %v404_v62, 0.0 }
  0xda   : > { %v490_v4 = vmax.f32 %v453_v0, 0.0 }
  0xdb   : > { %v546_v5 = vpack.c.bf16 %v489_v2, %v487_v1  ;;  %v1583_v1 = vld [vmem:[#allocation2 + $0x40] sm:$0xff] }
  0xdc   : > { %v547_v6 = vpack.c.bf16 %v490_v4, %v488_v3  ;;  %1153 = vmatpush.bf16.msrb.mxu3 %v1583_v1 }
  0xdd   : > { %744 = vmatmul.bf16.gmra.mxu2 %v546_v5  ;;  %842 = vmatmul.bf16.gmra.mxu0 %v546_v5 }
  0xde   : > { %793 = vmatmul.bf16.gmra.mxu3 %v547_v6  ;;  %891 = vmatmul.bf16.gmra.mxu1 %v547_v6  ;;  %v406_v9 = vpop.f32.mrf.mxu0 }
  0xdf   : > { %v455_v10 = vpop.f32.mrf.mxu1  ;;  %v407_v13 = vadd.f32 %v406_v9, %v2105_v7 }
  0xe0   : > { %v456_v14 = vadd.f32 %v455_v10, %v2107_v8 }
  0xe1   : > { %v491_v19 = vmax.f32 %v407_v13, 0.0 }
  0xe2   : > { %v492_v21 = vmax.f32 %v456_v14, 0.0 }
  0xe6   : > { %v408_v15 = vpop.f32.mrf.mxu0 }
  0xe7   : > { %v409_v16 = vadd.f32 %v408_v15, %v2105_v7  ;;  %v457_v17 = vpop.f32.mrf.mxu1 }
  0xe8   : > { %v458_v18 = vadd.f32 %v457_v17, %v2107_v8 }
  0xe9   : > { %v493_v20 = vmax.f32 %v409_v16, 0.0 }
  0xea   : > { %v494_v22 = vmax.f32 %v458_v18, 0.0 }
  0xeb   : > { %v548_v23 = vpack.c.bf16 %v493_v20, %v491_v19 }
  0xec   : > { %v549_v24 = vpack.c.bf16 %v494_v22, %v492_v21 }
  0xed   : > { %749 = vmatmul.bf16.gmra.mxu2 %v548_v23  ;;  %847 = vmatmul.bf16.gmra.mxu0 %v548_v23 }
  0xee   : > { %798 = vmatmul.bf16.gmra.mxu3 %v549_v24  ;;  %896 = vmatmul.bf16.gmra.mxu1 %v549_v24  ;;  %v411_v25 = vpop.f32.mrf.mxu0 }
  0xef   : > { %v460_v26 = vpop.f32.mrf.mxu1  ;;  %v412_v29 = vadd.f32 %v411_v25, %v2105_v7 }
  0xf0   : > { %v461_v30 = vadd.f32 %v460_v26, %v2107_v8 }
  0xf1   : > { %v495_v35 = vmax.f32 %v412_v29, 0.0 }
  0xf2   : > { %v496_v37 = vmax.f32 %v461_v30, 0.0 }
  0xf6   : > { %v413_v31 = vpop.f32.mrf.mxu0 }
  0xf7   : > { %v414_v32 = vadd.f32 %v413_v31, %v2105_v7  ;;  %v462_v33 = vpop.f32.mrf.mxu1 }
  0xf8   : > { %v463_v34 = vadd.f32 %v462_v33, %v2107_v8 }
  0xf9   : > { %v497_v36 = vmax.f32 %v414_v32, 0.0 }
  0xfa   : > { %v498_v38 = vmax.f32 %v463_v34, 0.0 }
  0xfb   : > { %v550_v39 = vpack.c.bf16 %v497_v36, %v495_v35 }
  0xfc   : > { %v551_v40 = vpack.c.bf16 %v498_v38, %v496_v37 }
  0xfd   : > { %754 = vmatmul.bf16.gmra.mxu2 %v550_v39  ;;  %852 = vmatmul.bf16.gmra.mxu0 %v550_v39 }
  0xfe   : > { %803 = vmatmul.bf16.gmra.mxu3 %v551_v40  ;;  %901 = vmatmul.bf16.gmra.mxu1 %v551_v40  ;;  %v416_v41 = vpop.f32.mrf.mxu0 }
  0xff   : > { %v465_v44 = vpop.f32.mrf.mxu1  ;;  %v417_v45 = vadd.f32 %v416_v41, %v2105_v7 }
 0x100   : > { %v466_v46 = vadd.f32 %v465_v44, %v2107_v8 }
 0x101   : > { %v499_v51 = vmax.f32 %v417_v45, 0.0 }
 0x102   : > { %v500_v53 = vmax.f32 %v466_v46, 0.0 }
 0x106   : > { %v418_v47 = vpop.f32.mrf.mxu0 }
 0x107   : > { %v419_v48 = vadd.f32 %v418_v47, %v2105_v7  ;;  %v467_v49 = vpop.f32.mrf.mxu1 }
 0x108   : > { %v468_v50 = vadd.f32 %v467_v49, %v2107_v8 }
 0x109   : > { %v501_v52 = vmax.f32 %v419_v48, 0.0 }
 0x10a   : > { %v502_v54 = vmax.f32 %v468_v50, 0.0 }
 0x10b   : > { %v552_v55 = vpack.c.bf16 %v501_v52, %v499_v51 }
 0x10c   : > { %v553_v56 = vpack.c.bf16 %v502_v54, %v500_v53 }
 0x10d   : > { %759 = vmatmul.bf16.gmra.mxu2 %v552_v55  ;;  %857 = vmatmul.bf16.gmra.mxu0 %v552_v55 }
 0x10e   : > { %808 = vmatmul.bf16.gmra.mxu3 %v553_v56  ;;  %906 = vmatmul.bf16.gmra.mxu1 %v553_v56  ;;  %v421_v57 = vpop.f32.mrf.mxu0 }
 0x10f   : > { %v470_v58 = vpop.f32.mrf.mxu1  ;;  %v422_v59 = vadd.f32 %v421_v57, %v2105_v7 }
 0x110   : > { %v471_v61 = vadd.f32 %v470_v58, %v2107_v8 }
 0x111   : > { %v503_v3 = vmax.f32 %v422_v59, 0.0 }
 0x112   : > { %v504_v5 = vmax.f32 %v471_v61, 0.0 }
 0x116   : > { %v423_v62 = vpop.f32.mrf.mxu0 }
 0x117   : > { %v424_v63 = vadd.f32 %v423_v62, %v2105_v7  ;;  %v472_v0 = vpop.f32.mrf.mxu1  ;;  %v539_v7 = vld [vmem:[%s2260_s4] sm:$0x3] }
 0x118   : > { %v473_v2 = vadd.f32 %v472_v0, %v2107_v8  ;;  %v2144_v12 = vperm.slane %v539_v7, 1  ;;  %v2147_v15 = vperm.slane %v539_v7, 0 }
 0x119   : > { %v505_v4 = vmax.f32 %v424_v63, 0.0 }
 0x11a   : > { %v506_v6 = vmax.f32 %v473_v2, 0.0 }
 0x11b   : > { %v554_v9 = vpack.c.bf16 %v505_v4, %v503_v3 }
 0x11c   : > { %v555_v10 = vpack.c.bf16 %v506_v6, %v504_v5 }
 0x11d   : > { %764 = vmatmul.bf16.gmra.mxu2 %v554_v9  ;;  %862 = vmatmul.bf16.gmra.mxu0 %v554_v9 }
 0x11e   : > { %813 = vmatmul.bf16.gmra.mxu3 %v555_v10  ;;  %911 = vmatmul.bf16.gmra.mxu1 %v555_v10 }
 0x12a   : > { %v828_v11 = vpop.f32.mrf.mxu0 }
 0x12b   : > { %v877_v13 = vpop.f32.mrf.mxu1  ;;  %v829_v8 = vadd.f32 %v828_v11, %v2144_v12 }
 0x12d   : > { %v878_v18 = vadd.f32 %v877_v13, %v829_v8 }
 0x12f   : > { %v918_v23 = vmax.f32 %v878_v18, 0.0 }
 0x130   : > { %v730_v14 = vpop.f32.mrf.mxu2 }
 0x131   : > { %v779_v16 = vpop.f32.mrf.mxu3  ;;  %v731_v21 = vadd.f32 %v730_v14, %v2147_v15 }
 0x132   : > { %v830_v17 = vpop.f32.mrf.mxu0 }
 0x133   : > { %v831_v19 = vadd.f32 %v830_v17, %v2144_v12  ;;  %v879_v20 = vpop.f32.mrf.mxu1  ;;  %v780_v26 = vadd.f32 %v779_v16, %v731_v21 }
 0x135   : > { %v880_v22 = vadd.f32 %v879_v20, %v831_v19  ;;  %v917_v33 = vmax.f32 %v780_v26, 0.0 }
 0x137   : > { %v920_v24 = vmax.f32 %v880_v22, 0.0 }
 0x138   : > { %v732_v25 = vpop.f32.mrf.mxu2 }
 0x139   : > { %v983_v27 = vpack.c.bf16 %v920_v24, %v918_v23  ;;  %v733_v28 = vadd.f32 %v732_v25, %v2147_v15  ;;  %v781_v29 = vpop.f32.mrf.mxu3 }
 0x13a   : > { %v833_v30 = vpop.f32.mrf.mxu0 }
 0x13b   : > { %v782_v31 = vadd.f32 %v781_v29, %v733_v28  ;;  %v882_v32 = vpop.f32.mrf.mxu1  ;;  %1154 = vmatmul.bf16.vlgmr.msrb.gmra.mxu3 %v983_v27  ;;  %v834_v35 = vadd.f32 %v833_v30, %v2144_v12 }
 0x13d   : > { %v919_v34 = vmax.f32 %v782_v31, 0.0  ;;  %v883_v40 = vadd.f32 %v882_v32, %v834_v35 }
 0x13f   : > { %v982_v36 = vpack.c.bf16 %v919_v34, %v917_v33  ;;  %v922_v45 = vmax.f32 %v883_v40, 0.0 }
 0x140   : > { %v735_v37 = vpop.f32.mrf.mxu2 }
 0x141   : > { %v784_v38 = vpop.f32.mrf.mxu3  ;;  %1105 = vmatmul.bf16.vlgmr.msrb.gmra.mxu2 %v982_v36  ;;  %v736_v43 = vadd.f32 %v735_v37, %v2147_v15 }
 0x142   : > { %v835_v39 = vpop.f32.mrf.mxu0 }
 0x143   : > { %v836_v41 = vadd.f32 %v835_v39, %v2144_v12  ;;  %v884_v42 = vpop.f32.mrf.mxu1  ;;  %v785_v48 = vadd.f32 %v784_v38, %v736_v43 }
 0x145   : > { %v885_v44 = vadd.f32 %v884_v42, %v836_v41  ;;  %v921_v55 = vmax.f32 %v785_v48, 0.0 }
 0x147   : > { %v924_v46 = vmax.f32 %v885_v44, 0.0 }
 0x148   : > { %v737_v47 = vpop.f32.mrf.mxu2 }
 0x149   : > { %v738_v49 = vadd.f32 %v737_v47, %v2147_v15  ;;  %v786_v50 = vpop.f32.mrf.mxu3  ;;  %v985_v51 = vpack.c.bf16 %v924_v46, %v922_v45 }
 0x14a   : > { %v838_v52 = vpop.f32.mrf.mxu0 }
 0x14b   : > { %v787_v53 = vadd.f32 %v786_v50, %v738_v49  ;;  %v887_v54 = vpop.f32.mrf.mxu1  ;;  %1159 = vmatmul.bf16.gmra.mxu3 %v985_v51  ;;  %v839_v57 = vadd.f32 %v838_v52, %v2144_v12 }
 0x14d   : > { %v923_v56 = vmax.f32 %v787_v53, 0.0  ;;  %v888_v62 = vadd.f32 %v887_v54, %v839_v57 }
 0x14f   : > { %v984_v58 = vpack.c.bf16 %v923_v56, %v921_v55  ;;  %v926_v3 = vmax.f32 %v888_v62, 0.0 }
 0x150   : > { %v740_v59 = vpop.f32.mrf.mxu2 }
 0x151   : > { %v789_v60 = vpop.f32.mrf.mxu3  ;;  %1110 = vmatmul.bf16.gmra.mxu2 %v984_v58  ;;  %v741_v1 = vadd.f32 %v740_v59, %v2147_v15 }
 0x152   : > { %v840_v61 = vpop.f32.mrf.mxu0 }
 0x153   : > { %v841_v63 = vadd.f32 %v840_v61, %v2144_v12  ;;  %v889_v0 = vpop.f32.mrf.mxu1  ;;  %v790_v6 = vadd.f32 %v789_v60, %v741_v1 }
 0x155   : > { %v890_v2 = vadd.f32 %v889_v0, %v841_v63  ;;  %v925_v14 = vmax.f32 %v790_v6, 0.0 }
 0x157   : > { %v928_v4 = vmax.f32 %v890_v2, 0.0 }
 0x158   : > { %v742_v5 = vpop.f32.mrf.mxu2 }
 0x159   : > { %v743_v9 = vadd.f32 %v742_v5, %v2147_v15  ;;  %v791_v10 = vpop.f32.mrf.mxu3  ;;  %v987_v7 = vpack.c.bf16 %v928_v4, %v926_v3 }
 0x15a   : > { %v843_v11 = vpop.f32.mrf.mxu0 }
 0x15b   : > { %v792_v13 = vadd.f32 %v791_v10, %v743_v9  ;;  %v892_v8 = vpop.f32.mrf.mxu1  ;;  %1164 = vmatmul.bf16.gmra.mxu3 %v987_v7  ;;  %v844_v17 = vadd.f32 %v843_v11, %v2144_v12 }
 0x15d   : > { %v927_v16 = vmax.f32 %v792_v13, 0.0  ;;  %v893_v22 = vadd.f32 %v892_v8, %v844_v17 }
 0x15f   : > { %v986_v18 = vpack.c.bf16 %v927_v16, %v925_v14  ;;  %v930_v27 = vmax.f32 %v893_v22, 0.0 }
 0x160   : > { %v745_v19 = vpop.f32.mrf.mxu2 }
 0x161   : > { %v794_v20 = vpop.f32.mrf.mxu3  ;;  %1115 = vmatmul.bf16.gmra.mxu2 %v986_v18  ;;  %v746_v25 = vadd.f32 %v745_v19, %v2147_v15 }
 0x162   : > { %v845_v21 = vpop.f32.mrf.mxu0 }
 0x163   : > { %v846_v23 = vadd.f32 %v845_v21, %v2144_v12  ;;  %v894_v24 = vpop.f32.mrf.mxu1  ;;  %v795_v30 = vadd.f32 %v794_v20, %v746_v25 }
 0x165   : > { %v895_v26 = vadd.f32 %v894_v24, %v846_v23  ;;  %v929_v37 = vmax.f32 %v795_v30, 0.0 }
 0x167   : > { %v932_v28 = vmax.f32 %v895_v26, 0.0 }
 0x168   : > { %v747_v29 = vpop.f32.mrf.mxu2 }
 0x169   : > { %v748_v31 = vadd.f32 %v747_v29, %v2147_v15  ;;  %v796_v32 = vpop.f32.mrf.mxu3  ;;  %v989_v33 = vpack.c.bf16 %v932_v28, %v930_v27 }
 0x16a   : > { %v848_v34 = vpop.f32.mrf.mxu0 }
 0x16b   : > { %v797_v35 = vadd.f32 %v796_v32, %v748_v31  ;;  %v897_v36 = vpop.f32.mrf.mxu1  ;;  %1169 = vmatmul.bf16.gmra.mxu3 %v989_v33  ;;  %v849_v39 = vadd.f32 %v848_v34, %v2144_v12 }
 0x16d   : > { %v931_v38 = vmax.f32 %v797_v35, 0.0  ;;  %v898_v44 = vadd.f32 %v897_v36, %v849_v39 }
 0x16f   : > { %v988_v40 = vpack.c.bf16 %v931_v38, %v929_v37  ;;  %v934_v49 = vmax.f32 %v898_v44, 0.0 }
 0x170   : > { %v750_v41 = vpop.f32.mrf.mxu2 }
 0x171   : > { %v799_v42 = vpop.f32.mrf.mxu3  ;;  %1120 = vmatmul.bf16.gmra.mxu2 %v988_v40  ;;  %v751_v47 = vadd.f32 %v750_v41, %v2147_v15 }
 0x172   : > { %v850_v43 = vpop.f32.mrf.mxu0 }
 0x173   : > { %v851_v45 = vadd.f32 %v850_v43, %v2144_v12  ;;  %v899_v46 = vpop.f32.mrf.mxu1  ;;  %v800_v52 = vadd.f32 %v799_v42, %v751_v47 }
 0x175   : > { %v900_v48 = vadd.f32 %v899_v46, %v851_v45  ;;  %v933_v59 = vmax.f32 %v800_v52, 0.0 }
 0x177   : > { %v936_v50 = vmax.f32 %v900_v48, 0.0 }
 0x178   : > { %v752_v51 = vpop.f32.mrf.mxu2 }
 0x179   : > { %v991_v53 = vpack.c.bf16 %v936_v50, %v934_v49  ;;  %v753_v54 = vadd.f32 %v752_v51, %v2147_v15  ;;  %v801_v55 = vpop.f32.mrf.mxu3 }
 0x17a   : > { %v853_v56 = vpop.f32.mrf.mxu0 }
 0x17b   : > { %v802_v57 = vadd.f32 %v801_v55, %v753_v54  ;;  %v902_v58 = vpop.f32.mrf.mxu1  ;;  %1174 = vmatmul.bf16.gmra.mxu3 %v991_v53  ;;  %v854_v62 = vadd.f32 %v853_v56, %v2144_v12 }
 0x17d   : > { %v935_v60 = vmax.f32 %v802_v57, 0.0  ;;  %v903_v2 = vadd.f32 %v902_v58, %v854_v62 }
 0x17f   : > { %v990_v61 = vpack.c.bf16 %v935_v60, %v933_v59  ;;  %v938_v9 = vmax.f32 %v903_v2, 0.0 }
 0x180   : > { %v755_v63 = vpop.f32.mrf.mxu2 }
 0x181   : > { %v804_v0 = vpop.f32.mrf.mxu3  ;;  %1125 = vmatmul.bf16.gmra.mxu2 %v990_v61  ;;  %v756_v5 = vadd.f32 %v755_v63, %v2147_v15 }
 0x182   : > { %v855_v1 = vpop.f32.mrf.mxu0 }
 0x183   : > { %v856_v3 = vadd.f32 %v855_v1, %v2144_v12  ;;  %v904_v4 = vpop.f32.mrf.mxu1  ;;  %v805_v11 = vadd.f32 %v804_v0, %v756_v5  ;;  %v2184_v0 = vld [vmem:[%s2262_s6] ss:$0 sm:$0xff] }
 0x185   : > { %v905_v6 = vadd.f32 %v904_v4, %v856_v3  ;;  %v937_v19 = vmax.f32 %v805_v11, 0.0 }
 0x187   : > { %v940_v10 = vmax.f32 %v905_v6, 0.0 }
 0x188   : > { %v757_v7 = vpop.f32.mrf.mxu2 }
 0x189   : > { %v993_v13 = vpack.c.bf16 %v940_v10, %v938_v9  ;;  %v758_v8 = vadd.f32 %v757_v7, %v2147_v15  ;;  %v806_v14 = vpop.f32.mrf.mxu3 }
 0x18a   : > { %v858_v16 = vpop.f32.mrf.mxu0 }
 0x18b   : > { %v807_v17 = vadd.f32 %v806_v14, %v758_v8  ;;  %v907_v18 = vpop.f32.mrf.mxu1  ;;  %1179 = vmatmul.bf16.gmra.mxu3 %v993_v13  ;;  %v859_v22 = vadd.f32 %v858_v16, %v2144_v12 }
 0x18d   : > { %v939_v20 = vmax.f32 %v807_v17, 0.0  ;;  %v908_v26 = vadd.f32 %v907_v18, %v859_v22 }
 0x18f   : > { %v992_v21 = vpack.c.bf16 %v939_v20, %v937_v19  ;;  %v942_v31 = vmax.f32 %v908_v26, 0.0 }
 0x190   : > { %v760_v23 = vpop.f32.mrf.mxu2 }
 0x191   : > { %v809_v24 = vpop.f32.mrf.mxu3  ;;  %1130 = vmatmul.bf16.gmra.mxu2 %v992_v21  ;;  %v761_v29 = vadd.f32 %v760_v23, %v2147_v15 }
 0x192   : > { %v860_v25 = vpop.f32.mrf.mxu0 }
 0x193   : > { %v861_v27 = vadd.f32 %v860_v25, %v2144_v12  ;;  %v909_v28 = vpop.f32.mrf.mxu1  ;;  %v810_v34 = vadd.f32 %v809_v24, %v761_v29 }
 0x195   : > { %v910_v30 = vadd.f32 %v909_v28, %v861_v27  ;;  %v941_v41 = vmax.f32 %v810_v34, 0.0 }
 0x197   : > { %v944_v32 = vmax.f32 %v910_v30, 0.0 }
 0x198   : > { %v762_v33 = vpop.f32.mrf.mxu2 }
 0x199   : > { %v995_v35 = vpack.c.bf16 %v944_v32, %v942_v31  ;;  %v763_v36 = vadd.f32 %v762_v33, %v2147_v15  ;;  %v811_v37 = vpop.f32.mrf.mxu3 }
 0x19a   : > { %v863_v38 = vpop.f32.mrf.mxu0 }
 0x19b   : > { %v812_v39 = vadd.f32 %v811_v37, %v763_v36  ;;  %v912_v40 = vpop.f32.mrf.mxu1  ;;  %1184 = vmatmul.bf16.gmra.mxu3 %v995_v35  ;;  %v864_v44 = vadd.f32 %v863_v38, %v2144_v12 }
 0x19d   : > { %v943_v42 = vmax.f32 %v812_v39, 0.0  ;;  %v913_v48 = vadd.f32 %v912_v40, %v864_v44 }
 0x19f   : > { %v994_v43 = vpack.c.bf16 %v943_v42, %v941_v41  ;;  %v946_v53 = vmax.f32 %v913_v48, 0.0 }
 0x1a0   : > { %v765_v45 = vpop.f32.mrf.mxu2 }
 0x1a1   : > { %v814_v46 = vpop.f32.mrf.mxu3  ;;  %1135 = vmatmul.bf16.gmra.mxu2 %v994_v43  ;;  %v766_v51 = vadd.f32 %v765_v45, %v2147_v15 }
 0x1a2   : > { %v865_v47 = vpop.f32.mrf.mxu0 }
 0x1a3   : > { %v866_v49 = vadd.f32 %v865_v47, %v2144_v12  ;;  %v914_v50 = vpop.f32.mrf.mxu1  ;;  %v815_v56 = vadd.f32 %v814_v46, %v766_v51 }
 0x1a5   : > { %v915_v52 = vadd.f32 %v914_v50, %v866_v49  ;;  %v945_v61 = vmax.f32 %v815_v56, 0.0 }
 0x1a7   : > { %v948_v54 = vmax.f32 %v915_v52, 0.0 }
 0x1a8   : > { %v767_v55 = vpop.f32.mrf.mxu2 }
 0x1a9   : > { %v997_v57 = vpack.c.bf16 %v948_v54, %v946_v53  ;;  %v768_v58 = vadd.f32 %v767_v55, %v2147_v15  ;;  %v816_v59 = vpop.f32.mrf.mxu3 }
 0x1ab   : > { %v817_v60 = vadd.f32 %v816_v59, %v768_v58  ;;  %1189 = vmatmul.bf16.gmra.mxu3 %v997_v57 }
 0x1ad   : > { %v947_v62 = vmax.f32 %v817_v60, 0.0 }
 0x1af   : > { %v996_v63 = vpack.c.bf16 %v947_v62, %v945_v61 }
 0x1b1   : > { %1140 = vmatmul.bf16.gmra.mxu2 %v996_v63 }
 0x1be   : > { %v1155_v12 = vpop.f32.mrf.mxu3 }
 0x1c4   : > { %v1106_v1 = vpop.f32.mrf.mxu2 }
 0x1c5   : > { %v1107_v2 = vadd.f32 %v2184_v0, %v1106_v1 }
 0x1c6   : > { %v1157_v15 = vpop.f32.mrf.mxu3 }
 0x1c7   : > { %v1156_v3 = vadd.f32 %v1155_v12, %v1107_v2 }
 0x1c9   : > { %1195 = vst [vmem:[%s2189_s19] sm:$0xff] %v1156_v3 }
 0x1cc   : > { %v1108_v4 = vpop.f32.mrf.mxu2 }
 0x1cd   : > { %v1109_v5 = vadd.f32 %v2184_v0, %v1108_v4 }
 0x1ce   : > { %v1160_v6 = vpop.f32.mrf.mxu3 }
 0x1cf   : > { %v1158_v9 = vadd.f32 %v1157_v15, %v1109_v5 }
 0x1d1   : > { %1196 = vst [vmem:[%s2189_s19 + $0x8] sm:$0xff] %v1158_v9 }
 0x1d4   : > { %v1111_v10 = vpop.f32.mrf.mxu2 }
 0x1d5   : > { %v1112_v7 = vadd.f32 %v2184_v0, %v1111_v10 }
 0x1d6   : > { %v1162_v11 = vpop.f32.mrf.mxu3 }
 0x1d7   : > { %v1161_v13 = vadd.f32 %v1160_v6, %v1112_v7 }
 0x1d9   : > { %1197 = vst [vmem:[%s2189_s19 + $0x10] sm:$0xff] %v1161_v13 }
 0x1dc   : > { %v1113_v8 = vpop.f32.mrf.mxu2 }
 0x1dd   : > { %v1114_v14 = vadd.f32 %v2184_v0, %v1113_v8 }
 0x1de   : > { %v1165_v16 = vpop.f32.mrf.mxu3 }
 0x1df   : > { %v1163_v17 = vadd.f32 %v1162_v11, %v1114_v14 }
 0x1e1   : > { %1198 = vst [vmem:[%s2189_s19 + $0x18] sm:$0xff] %v1163_v17 }
 0x1e4   : > { %v1116_v18 = vpop.f32.mrf.mxu2 }
 0x1e5   : > { %v1117_v19 = vadd.f32 %v2184_v0, %v1116_v18 }
 0x1e6   : > { %v1167_v20 = vpop.f32.mrf.mxu3 }
 0x1e7   : > { %v1166_v21 = vadd.f32 %v1165_v16, %v1117_v19 }
 0x1e9   : > { %1199 = vst [vmem:[%s2189_s19 + $0x20] sm:$0xff] %v1166_v21 }
 0x1ec   : > { %v1118_v22 = vpop.f32.mrf.mxu2 }
 0x1ed   : > { %v1119_v23 = vadd.f32 %v2184_v0, %v1118_v22 }
 0x1ee   : > { %v1170_v24 = vpop.f32.mrf.mxu3 }
 0x1ef   : > { %v1168_v25 = vadd.f32 %v1167_v20, %v1119_v23 }
 0x1f1   : > { %1200 = vst [vmem:[%s2189_s19 + $0x28] sm:$0xff] %v1168_v25 }
 0x1f4   : > { %v1121_v26 = vpop.f32.mrf.mxu2 }
 0x1f5   : > { %v1122_v27 = vadd.f32 %v2184_v0, %v1121_v26 }
 0x1f6   : > { %v1172_v28 = vpop.f32.mrf.mxu3 }
 0x1f7   : > { %v1171_v29 = vadd.f32 %v1170_v24, %v1122_v27 }
 0x1f9   : > { %1201 = vst [vmem:[%s2189_s19 + $0x30] sm:$0xff] %v1171_v29 }
 0x1fc   : > { %v1123_v30 = vpop.f32.mrf.mxu2 }
 0x1fd   : > { %v1124_v31 = vadd.f32 %v2184_v0, %v1123_v30 }
 0x1fe   : > { %v1175_v32 = vpop.f32.mrf.mxu3 }
 0x1ff   : > { %v1173_v33 = vadd.f32 %v1172_v28, %v1124_v31 }
 0x201   : > { %1202 = vst [vmem:[%s2189_s19 + $0x38] sm:$0xff] %v1173_v33 }
 0x204   : > { %v1126_v34 = vpop.f32.mrf.mxu2 }
 0x205   : > { %v1127_v35 = vadd.f32 %v2184_v0, %v1126_v34 }
 0x206   : > { %v1177_v36 = vpop.f32.mrf.mxu3 }
 0x207   : > { %v1176_v37 = vadd.f32 %v1175_v32, %v1127_v35 }
 0x209   : > { %1203 = vst [vmem:[%s2189_s19 + $0x40] sm:$0xff] %v1176_v37 }
 0x20c   : > { %v1128_v38 = vpop.f32.mrf.mxu2 }
 0x20d   : > { %v1129_v39 = vadd.f32 %v2184_v0, %v1128_v38 }
 0x20e   : > { %v1180_v40 = vpop.f32.mrf.mxu3 }
 0x20f   : > { %v1178_v41 = vadd.f32 %v1177_v36, %v1129_v39 }
 0x211   : > { %1204 = vst [vmem:[%s2189_s19 + $0x48] sm:$0xff] %v1178_v41 }
 0x214   : > { %v1131_v42 = vpop.f32.mrf.mxu2 }
 0x215   : > { %v1132_v43 = vadd.f32 %v2184_v0, %v1131_v42 }
 0x216   : > { %v1182_v44 = vpop.f32.mrf.mxu3 }
 0x217   : > { %v1181_v45 = vadd.f32 %v1180_v40, %v1132_v43 }
 0x219   : > { %1205 = vst [vmem:[%s2189_s19 + $0x50] sm:$0xff] %v1181_v45 }
 0x21c   : > { %v1133_v46 = vpop.f32.mrf.mxu2 }
 0x21d   : > { %v1134_v47 = vadd.f32 %v2184_v0, %v1133_v46 }
 0x21e   : > { %v1185_v49 = vpop.f32.mrf.mxu3 }
 0x21f   : > { %v1183_v48 = vadd.f32 %v1182_v44, %v1134_v47 }
 0x221   : > { %1206 = vst [vmem:[%s2189_s19 + $0x58] sm:$0xff] %v1183_v48 }
 0x224   : > { %v1136_v50 = vpop.f32.mrf.mxu2 }
 0x225   : > { %v1137_v51 = vadd.f32 %v2184_v0, %v1136_v50 }
 0x226   : > { %v1187_v53 = vpop.f32.mrf.mxu3 }
 0x227   : > { %v1186_v52 = vadd.f32 %v1185_v49, %v1137_v51 }
 0x229   : > { %1207 = vst [vmem:[%s2189_s19 + $0x60] sm:$0xff] %v1186_v52 }
 0x22c   : > { %v1138_v54 = vpop.f32.mrf.mxu2 }
 0x22d   : > { %v1139_v55 = vadd.f32 %v2184_v0, %v1138_v54 }
 0x22e   : > { %v1190_v57 = vpop.f32.mrf.mxu3 }
 0x22f   : > { %v1188_v56 = vadd.f32 %v1187_v53, %v1139_v55 }
 0x231   : > { %1208 = vst [vmem:[%s2189_s19 + $0x68] sm:$0xff] %v1188_v56 }
 0x234   : > { %v1141_v58 = vpop.f32.mrf.mxu2 }
 0x235   : > { %v1142_v59 = vadd.f32 %v2184_v0, %v1141_v58 }
 0x236   : > { %v1192_v63 = vpop.f32.mrf.mxu3 }
 0x237   : > { %v1191_v60 = vadd.f32 %v1190_v57, %v1142_v59 }
 0x239   : > { %1209 = vst [vmem:[%s2189_s19 + $0x70] sm:$0xff] %v1191_v60 }
 0x23c   : > { %v1143_v61 = vpop.f32.mrf.mxu2 }
 0x23d   : > { %v1144_v62 = vadd.f32 %v2184_v0, %v1143_v61 }
 0x23f   : > { %v1193_v12 = vadd.f32 %v1192_v63, %v1144_v62 }
 0x241   : > { %1210 = vst [vmem:[%s2189_s19 + $0x78] sm:$0xff] %v1193_v12 }
 0x242   : > { %1704 = shalt.err (!%p1701_p8)
}
 0x243   : > { %s1748_s14 = smov 128   ;;  %s1749_s19 = smov 8  }
 0x244   : > { %1596 = dma.vmem_to_hbm [thread:$0]  (%p1828_p5), %s1225_s8, 2048, %s1227_s21, %s1212_s9, %s1748_s14, %s1748_s14, %s1749_s19  }
 0x245 PF: > { %p1608_p9 = scmp.ge.s32.totalorder %s1743_s27, 2  ;;  %s1241_s22 = sand.u32 1, %s1731_s24  }
 0x246   : > { %s1242_s23 = scalar_lea.sflag [#allocation4], %s1241_s22 }
 0x247   : > { %p1603_p10 = pnand %p1608_p9, %p1832_p6 }
 0x249   : > { %p1604_p11 = pneg %p1603_p10 }
 0x24b   : > { %1726 = dma.done.wait (%p1604_p11), %s1242_s23, 2048  }
 0x24c   : > { %1728 = vsyncadd (%p1604_p11), %s1242_s23, 4294965248  ;;  %p18_p12 = scmp.ge.s32.totalorder %s1815_s30, 4   ;;  %s2266_s24 = smov %s1735_s25 }
 0x24d   : > { %s2267_s25 = smov %s1739_s26  ;;  %s2268_s26 = smov %s1826_s10 }
 0x24e   : > { %s2269_s27 = smov %s1815_s30  ;;  %20 = sbr.rel (!%p18_p12) target bundleno = 4 (0x4), region = 88 }
 0x253   :  { %1248 = vsyncpa [#allocation3], 1 }
 0x254   :  { %1250 = vsyncpa [#allocation3 + $0x1], 1 }
 0x255   :  { %1251 = vsyncpa [#allocation4], 1 }
 0x256   :  { %1253 = vsyncpa [#allocation4 + $0x1], 1 }

</bundles_post_ra>
